<compile_context>
chip_gen: v6e
topology: v6e:2x2x1
jax: 0.10.0
libtpu: 0.0.40
codegen_flags: <defaults>
</compile_context>

<pallas_src>
import functools

import jax
import jax.numpy as jnp
from jax.experimental import pallas as pl
from jax.experimental.pallas import tpu as pltpu

_NEG = -1e30       # "minus infinity" for masked maxima
_LANES = 128       # TPU lane width
_TILE_ROWS = 512   # CE rows per grid step (multiple of 8)


def _round_up(x, m):
    return ((x + m - 1) // m) * m


def _plan_rows(n_rows):
    """Row tiling plan: 2 parallel halves (v7x megacore) x tiles of <=512 rows."""
    half = _round_up(max((n_rows + 1) // 2, 8), 8)
    tile_r = min(_TILE_ROWS, half)
    tiles_per_half = -(-half // tile_r)
    return tile_r, 2 * tiles_per_half * tile_r


# ----------------------------------------------------------------------------
# Fused Pallas kernel: entity CE + relation CE + cardinality + box L1/GIoU
# ----------------------------------------------------------------------------

def _fused_criterion_kernel(ent_logits_ref, ent_side_ref,
                            rel_logits_ref, rel_side_ref,
                            tgt_len_ref, boxes_ref, out_ref):
    f32 = jnp.float32
    half = pl.program_id(0)   # parallel axis: 2 halves of the CE rows
    step = pl.program_id(1)   # arbitrary axis: row tiles inside a half
    lane = jax.lax.broadcasted_iota(jnp.int32, (1, 1, _LANES), 2)

    @pl.when(step == 0)
    def _init():
        out_ref[...] = jnp.zeros_like(out_ref)

    # --- one-shot small losses (rel CE, cardinality, boxes), half 0 only -----
    @pl.when((step == 0) & (half == 0))
    def _small():
        rl = rel_logits_ref[...].astype(f32)                       # (B, Qr, R1)
        b, qr, r1 = rl.shape
        noobj_cls = r1 - 1
        side = rel_side_ref[...].astype(f32)                       # (B, Qr, 2)
        rtgt = side[..., 0:1].astype(jnp.int32)
        rw = side[..., 1:2]                                        # w_rel[tgt]
        cls_r = jax.lax.broadcasted_iota(jnp.int32, (1, 1, r1), 2)

        # relation (predicate) weighted CE (shares rl / per-row max w/ card.)
        m_r = jnp.max(rl, axis=-1, keepdims=True)
        lse_r = jnp.log(jnp.sum(jnp.exp(rl - m_r), axis=-1, keepdims=True)) + m_r
        logit_t = jnp.sum(jnp.where(cls_r == rtgt, rl, 0.0), axis=-1, keepdims=True)
        ce_r = lse_r - logit_t
        rel_num = jnp.sum(ce_r * rw)
        rel_den = jnp.sum(rw)

        # cardinality: mean_b | #(argmax != no-object) - len_b |
        last_logit = rl[..., noobj_cls:noobj_cls + 1]              # static slice
        others_max = jnp.max(jnp.where(cls_r == noobj_cls, f32(_NEG), rl),
                             axis=-1, keepdims=True)
        not_empty = (others_max >= last_logit).astype(f32)         # (B, Qr, 1)
        card_pred = jnp.sum(not_empty, axis=1)                     # (B, 1)
        card_err = jnp.sum(jnp.abs(card_pred - tgt_len_ref[...].astype(f32))) / f32(b)

        # boxes: coords on sublanes, boxes on lanes; 2-row slabs for corners
        bx = boxes_ref[...].astype(f32)                            # (8, NP)
        s, t = bx[0:4, :], bx[4:8, :]
        l1_sum = jnp.sum(jnp.abs(s - t))
        s_lo = s[0:2, :] - 0.5 * s[2:4, :]
        s_hi = s[0:2, :] + 0.5 * s[2:4, :]
        t_lo = t[0:2, :] - 0.5 * t[2:4, :]
        t_hi = t[0:2, :] + 0.5 * t[2:4, :]
        i_wh = jnp.maximum(jnp.minimum(s_hi, t_hi) - jnp.maximum(s_lo, t_lo), 0.0)
        e_wh = jnp.maximum(jnp.maximum(s_hi, t_hi) - jnp.minimum(s_lo, t_lo), 0.0)
        s_wh = s_hi - s_lo
        t_wh = t_hi - t_lo
        inter = i_wh[0:1, :] * i_wh[1:2, :]
        union = s_wh[0:1, :] * s_wh[1:2, :] + t_wh[0:1, :] * t_wh[1:2, :] - inter
        earea = e_wh[0:1, :] * e_wh[1:2, :]
        # eps guards: degenerate (zero-area) predictions would otherwise NaN
        iou = inter / jnp.maximum(union, 1e-9)
        giou = iou - (earea - union) / jnp.maximum(earea, 1e-9)
        giou_sum = jnp.sum(1.0 - giou)

        small = (jnp.where(lane == 2, rel_num, 0.0)
                 + jnp.where(lane == 3, rel_den, 0.0)
                 + jnp.where(lane == 4, card_err, 0.0)
                 + jnp.where(lane == 5, l1_sum, 0.0)
                 + jnp.where(lane == 6, giou_sum, 0.0))
        out_ref[...] = jnp.broadcast_to(small, out_ref.shape).astype(f32)

    # --- per-tile entity/subject/object weighted CE (every grid step) --------
    logits = ent_logits_ref[...].astype(f32)                       # (TILE_R, C1)
    _, c1 = logits.shape
    side = ent_side_ref[...].astype(f32)                           # (TILE_R, 3)
    tgt = side[:, 0:1].astype(jnp.int32)
    w_num = side[:, 1:2]          # empty_weight[tgt] * loss_weight
    w_den = side[:, 2:3]          # empty_weight[tgt]
    cls = jax.lax.broadcasted_iota(jnp.int32, (1, c1), 1)
    m = jnp.max(logits, axis=-1, keepdims=True)
    lse = jnp.log(jnp.sum(jnp.exp(logits - m), axis=-1, keepdims=True)) + m
    logit_t = jnp.sum(jnp.where(cls == tgt, logits, 0.0), axis=-1, keepdims=True)
    ce = lse - logit_t                                             # (TILE_R, 1)
    ent_num = jnp.sum(ce * w_num)
    ent_den = jnp.sum(w_den)

    out_ref[...] = out_ref[...] + (jnp.where(lane == 0, ent_num, 0.0)
                                   + jnp.where(lane == 1, ent_den, 0.0))


@functools.partial(jax.jit, static_argnames=("tile_r",))
def _fused_losses_call(ent_logits, ent_side, rel_logits, rel_side,
                       tgt_len, boxes, *, tile_r):
    n_pad, c1 = ent_logits.shape
    b, qr, r1 = rel_logits.shape
    np_box = boxes.shape[1]
    tiles_per_half = (n_pad // 2) // tile_r

    row_map = lambda h, i: (h * tiles_per_half + i, 0)
    const3 = lambda h, i: (0, 0, 0)
    const2 = lambda h, i: (0, 0)

    out = pl.pallas_call(
        _fused_criterion_kernel,
        out_shape=jax.ShapeDtypeStruct((2, 8, _LANES), jnp.float32),
        grid_spec=pltpu.PrefetchScalarGridSpec(
            num_scalar_prefetch=0,
            grid=(2, tiles_per_half),
            in_specs=[
                pl.BlockSpec((tile_r, c1), row_map),       # entity logits rows
                pl.BlockSpec((tile_r, 3), row_map),        # [tgt, w*lw, w]
                pl.BlockSpec((b, qr, r1), const3),         # relation logits
                pl.BlockSpec((b, qr, 2), const3),          # [rel tgt, rel w]
                pl.BlockSpec((b, 1), const2),              # target lengths
                pl.BlockSpec((8, np_box), const2),         # packed boxes
            ],
            out_specs=pl.BlockSpec((1, 8, _LANES), lambda h, i: (h, 0, 0)),
        ),
        compiler_params=pltpu.CompilerParams(
            dimension_semantics=("parallel", "arbitrary"),
            vmem_limit_bytes=32 * 1024 * 1024),
    )(ent_logits, ent_side, rel_logits, rel_side, tgt_len, boxes)
    # sum the two halves' partial rows -> one (128,) loss row
    return out[0, 0] + out[1, 0]


# ----------------------------------------------------------------------------
# Plain-JAX glue (gather/scatter target construction, logging accuracies)
# ----------------------------------------------------------------------------

def _get_src_permutation_idx(indices):
    batch_idx = jnp.concatenate(
        [jnp.full_like(src, i) for i, (src, _) in enumerate(indices)])
    src_idx = jnp.concatenate([src for src, _ in indices])
    return batch_idx, src_idx


def _accuracy_top1(logits, target):
    pred = jnp.argmax(logits, axis=-1)
    return 100.0 * jnp.mean((pred == target).astype(jnp.float32))


def _pack_boxes(src_boxes, tgt_boxes, n_pad):
    """(N,4)x2 cxcywh -> (8, n_pad): rows 0-3 src coords, rows 4-7 tgt coords.

    Padded columns hold identical valid dummy boxes so their L1 and 1-GIoU
    contributions are exactly zero."""
    n = src_boxes.shape[0]
    dummy = jnp.full((n_pad - n, 4), 0.5, jnp.float32)
    s = jnp.concatenate([src_boxes.astype(jnp.float32), dummy], axis=0)
    t = jnp.concatenate([tgt_boxes.astype(jnp.float32), dummy], axis=0)
    return jnp.concatenate([s.T, t.T], axis=0)


# ----------------------------------------------------------------------------
# SetCriterion (JAX / Pallas)
# ----------------------------------------------------------------------------

class SetCriterionPallas:
    """RelTR SetCriterion forward; all loss reductions run in one fused Pallas
    TPU kernel per decoder layer."""

    def __init__(self, num_classes, num_rel_classes, matcher, weight_dict,
                 eos_coef, losses):
        self.num_classes = num_classes
        self.matcher = matcher
        self.weight_dict = weight_dict
        self.eos_coef = eos_coef
        self.losses = losses

        self.empty_weight = jnp.ones(num_classes + 1, jnp.float32).at[-1].set(eos_coef)
        self.num_rel_classes = 51 if num_classes == 151 else 30
        self.empty_weight_rel = jnp.ones(num_rel_classes + 1, jnp.float32).at[-1].set(eos_coef)

    # --- all losses for one set of outputs, single fused pallas_call ----------
    def _compute_losses(self, outputs, targets, indices, num_boxes, log=True):
        pred_logits = outputs['pred_logits']
        sub_logits = outputs['sub_logits']
        obj_logits = outputs['obj_logits']
        rel_logits = outputs['rel_logits']
        B, Q, C1 = pred_logits.shape
        Qr = rel_logits.shape[1]
        T = Q + 2 * Qr

        # ---- classification targets (gather/scatter glue, plain JAX) --------
        ent_b, ent_s = _get_src_permutation_idx(indices[0])
        target_classes_o = jnp.concatenate(
            [t['labels'][J] for t, (_, J) in zip(targets, indices[0])]).astype(jnp.int32)
        target_classes = jnp.full((B, Q), self.num_classes, jnp.int32)
        target_classes = target_classes.at[ent_b, ent_s].set(target_classes_o)

        rel_b, rel_s = _get_src_permutation_idx(indices[1])
        t_sub_o = jnp.concatenate(
            [t['labels'][t['rel_annotations'][J, 0]] for t, (_, J) in zip(targets, indices[1])]).astype(jnp.int32)
        t_obj_o = jnp.concatenate(
            [t['labels'][t['rel_annotations'][J, 1]] for t, (_, J) in zip(targets, indices[1])]).astype(jnp.int32)
        target_sub = jnp.full((B, Qr), self.num_classes, jnp.int32).at[rel_b, rel_s].set(t_sub_o)
        target_obj = jnp.full((B, Qr), self.num_classes, jnp.int32).at[rel_b, rel_s].set(t_obj_o)

        src_logits = jnp.concatenate([pred_logits, sub_logits, obj_logits], axis=1)   # (B, T, C1)
        tgt_all = jnp.concatenate([target_classes, target_sub, target_obj], axis=1)   # (B, T)
        loss_weight = jnp.concatenate(
            [jnp.ones((B, Q), jnp.float32),
             indices[2].astype(jnp.float32) * 0.5,
             indices[3].astype(jnp.float32) * 0.5], axis=-1)                          # (B, T)

        # class-weight gather hoisted out of the kernel; pack per-row side data
        w_ent = self.empty_weight[tgt_all]                                            # (B, T)
        ent_side = jnp.stack([tgt_all.astype(jnp.float32),
                              w_ent * loss_weight,
                              w_ent], axis=-1).reshape(B * T, 3)
        ent_logits2d = src_logits.reshape(B * T, C1)

        tile_r, n_pad = _plan_rows(B * T)
        pad = n_pad - B * T
        if pad > 0:
            ent_logits2d = jnp.pad(ent_logits2d, ((0, pad), (0, 0)))
            ent_side = jnp.pad(ent_side, ((0, pad), (0, 0)))        # zero weight rows

        # relation targets / weights
        t_rel_o = jnp.concatenate(
            [t['rel_annotations'][J, 2] for t, (_, J) in zip(targets, indices[1])]).astype(jnp.int32)
        target_rel = jnp.full((B, Qr), self.num_rel_classes, jnp.int32).at[rel_b, rel_s].set(t_rel_o)
        w_rel = self.empty_weight_rel[target_rel]
        rel_side = jnp.stack([target_rel.astype(jnp.float32), w_rel], axis=-1)        # (B, Qr, 2)

        tgt_len = jnp.array([[t['rel_annotations'].shape[0]] for t in targets],
                            jnp.float32)                                              # (B, 1)

        # ---- matched boxes ----------------------------------------------------
        pred_boxes = outputs['pred_boxes'][ent_b, ent_s]
        tgt_ent_boxes = jnp.concatenate(
            [t['boxes'][i] for t, (_, i) in zip(targets, indices[0])], axis=0)
        tgt_sub_boxes = jnp.concatenate(
            [t['boxes'][t['rel_annotations'][i, 0]] for t, (_, i) in zip(targets, indices[1])], axis=0)
        tgt_obj_boxes = jnp.concatenate(
            [t['boxes'][t['rel_annotations'][i, 1]] for t, (_, i) in zip(targets, indices[1])], axis=0)
        sub_boxes = outputs['sub_boxes'][rel_b, rel_s]
        obj_boxes = outputs['obj_boxes'][rel_b, rel_s]
        src_boxes = jnp.concatenate([pred_boxes, sub_boxes, obj_boxes], axis=0)
        tgt_boxes = jnp.concatenate([tgt_ent_boxes, tgt_sub_boxes, tgt_obj_boxes], axis=0)

        # NOTE: n_box_pad buckets to 128, so the jitted call only recompiles when
        # the matched-box count crosses a 128-lane bucket.
        n_box_pad = _round_up(max(src_boxes.shape[0], 1), _LANES)
        boxes = _pack_boxes(src_boxes, tgt_boxes, n_box_pad)                          # (8, NP)

        row = _fused_losses_call(ent_logits2d, ent_side, rel_logits, rel_side,
                                 tgt_len, boxes, tile_r=tile_r)

        losses = {}
        if 'labels' in self.losses:
            losses['loss_ce'] = row[0] / row[1]
            if log:
                losses['class_error'] = 100.0 - _accuracy_top1(pred_logits[ent_b, ent_s], target_classes_o)
                losses['sub_error'] = 100.0 - _accuracy_top1(sub_logits[rel_b, rel_s], t_sub_o)
                losses['obj_error'] = 100.0 - _accuracy_top1(obj_logits[rel_b, rel_s], t_obj_o)
        if 'cardinality' in self.losses:
            losses['cardinality_error'] = row[4]
        if 'boxes' in self.losses:
            losses['loss_bbox'] = row[5] / num_boxes
            losses['loss_giou'] = row[6] / num_boxes
        if 'relations' in self.losses:
            losses['loss_rel'] = row[2] / row[3]
            if log:
                losses['rel_error'] = 100.0 - _accuracy_top1(rel_logits[rel_b, rel_s], t_rel_o)
        return losses

    def __call__(self, outputs, targets):
        outputs_without_aux = {k: v for k, v in outputs.items() if k != 'aux_outputs'}
        # TODO(synk): Hungarian matcher (scipy linear_sum_assignment) has no clean
        # Pallas equivalent; the injected matcher decides the assignment.
        indices = self.matcher(outputs_without_aux, targets)
        self.indices = indices
        num_boxes = sum(t['labels'].shape[0] + t['rel_annotations'].shape[0] for t in targets)
        # TODO(synk): torch.distributed all-reduce of num_boxes omitted (world_size == 1).
        num_boxes = max(float(num_boxes), 1.0)

        losses = self._compute_losses(outputs, targets, indices, num_boxes, log=True)

        if 'aux_outputs' in outputs:
            # TODO(synk): aux decoder layers could be stacked on an extra grid axis of a
            # single pallas_call; kept at one fused (jit-cached) call per layer here.
            for i, aux_outputs in enumerate(outputs['aux_outputs']):
                aux_indices = self.matcher(aux_outputs, targets)
                l_dict = self._compute_losses(aux_outputs, targets, aux_indices,
                                              num_boxes, log=False)
                losses.update({k + f'_{i}': v for k, v in l_dict.items()})
        return losses


# ----------------------------------------------------------------------------
# Synthetic deterministic matcher (identity assignment)
# ----------------------------------------------------------------------------

def synthetic_matcher(outputs, targets):
    # TODO(synk): Hungarian assignment has no clean Pallas equivalent; use identity.
    ent, rel = [], []
    for t in targets:
        n = t['labels'].shape[0]
        m = t['rel_annotations'].shape[0]
        ent.append((jnp.arange(n, dtype=jnp.int32), jnp.arange(n, dtype=jnp.int32)))
        rel.append((jnp.arange(m, dtype=jnp.int32), jnp.arange(m, dtype=jnp.int32)))
    B, Qr = outputs['sub_logits'].shape[:2]
    sub_w = jnp.ones((B, Qr), jnp.float32)
    obj_w = jnp.ones((B, Qr), jnp.float32)
    return (ent, rel, sub_w, obj_w)


# ----------------------------------------------------------------------------
# Main
# ----------------------------------------------------------------------------

if __name__ == "__main__":
    key = jax.random.PRNGKey(0)
    B, Q, Qr = 2, 8, 8
    num_classes, num_rel_classes = 15, 30
    C1, R1 = num_classes + 1, num_rel_classes + 1

    ks = jax.random.split(key, 10)
    outputs = {
        'pred_logits': jax.random.normal(ks[0], (B, Q, C1), jnp.float32),
        'pred_boxes': jax.nn.sigmoid(jax.random.normal(ks[1], (B, Q, 4), jnp.float32)),
        'sub_logits': jax.random.normal(ks[2], (B, Qr, C1), jnp.float32),
        'obj_logits': jax.random.normal(ks[3], (B, Qr, C1), jnp.float32),
        'sub_boxes': jax.nn.sigmoid(jax.random.normal(ks[4], (B, Qr, 4), jnp.float32)),
        'obj_boxes': jax.nn.sigmoid(jax.random.normal(ks[5], (B, Qr, 4), jnp.float32)),
        'rel_logits': jax.random.normal(ks[6], (B, Qr, R1), jnp.float32),
    }
    targets = [
        {'labels': jnp.array([1, 4, 7], jnp.int32),
         'boxes': jax.nn.sigmoid(jax.random.normal(ks[7], (3, 4), jnp.float32)),
         'rel_annotations': jnp.array([[0, 1, 5], [1, 2, 10]], jnp.int32)},
        {'labels': jnp.array([2, 3, 9, 11], jnp.int32),
         'boxes': jax.nn.sigmoid(jax.random.normal(ks[8], (4, 4), jnp.float32)),
         'rel_annotations': jnp.array([[0, 3, 2], [1, 2, 7], [3, 0, 20]], jnp.int32)},
    ]

    weight_dict = {'loss_ce': 1.0, 'loss_rel': 1.0, 'loss_bbox': 5.0, 'loss_giou': 2.0}
    criterion = SetCriterionPallas(num_classes, num_rel_classes,
                                   matcher=synthetic_matcher,
                                   weight_dict=weight_dict,
                                   eos_coef=0.1,
                                   losses=['labels', 'boxes', 'cardinality', 'relations'])

    losses = criterion(outputs, targets)
    jax.tree_util.tree_map(jax.block_until_ready, losses)
    print("KERNEL_OK")
</pallas_src>

<mosaic_0001>
module attributes {stable_mosaic.version = 11 : i64} {
  func.func @_fused_criterion_kernel(%arg0: i32, %arg1: i32, %arg2: memref<24x16xf32, #tpu.memory_space<vmem>>, %arg3: memref<24x3xf32, #tpu.memory_space<vmem>>, %arg4: memref<2x8x31xf32, #tpu.memory_space<vmem>>, %arg5: memref<2x8x2xf32, #tpu.memory_space<vmem>>, %arg6: memref<2x1xf32, #tpu.memory_space<vmem>>, %arg7: memref<8x128xf32, #tpu.memory_space<vmem>>, %arg8: memref<1x8x128xf32, #tpu.memory_space<vmem>>) attributes {dimension_semantics = [#tpu.dimension_semantics<parallel>, #tpu.dimension_semantics<arbitrary>], iteration_bounds = array<i64: 2, 1>, scalar_prefetch = 0 : i64, scratch_operands = 0 : i64, tpu.core_type = #tpu.core_type<tc>, window_params = [{transform_indices = @transform_0, window_bounds = array<i64: 24, 16>}, {transform_indices = @transform_1, window_bounds = array<i64: 24, 3>}, {pipeline_mode = #tpu.pipeline_mode<synchronous>, transform_indices = @transform_2, window_bounds = array<i64: 2, 8, 31>}, {pipeline_mode = #tpu.pipeline_mode<synchronous>, transform_indices = @transform_3, window_bounds = array<i64: 2, 8, 2>}, {pipeline_mode = #tpu.pipeline_mode<synchronous>, transform_indices = @transform_4, window_bounds = array<i64: 2, 1>}, {pipeline_mode = #tpu.pipeline_mode<synchronous>, transform_indices = @transform_5, window_bounds = array<i64: 8, 128>}, {transform_indices = @transform_6, window_bounds = array<i64: 1, 8, 128>}]} {
    %0 = tpu.iota {dimensions = array<i32: 2>} : vector<1x1x128xi32>
    %c0_i32 = arith.constant 0 : i32
    %1 = arith.cmpi eq, %arg1, %c0_i32 : i32
    %2 = arith.extui %1 : i1 to i32
    %c0_i32_0 = arith.constant 0 : i32
    %3 = arith.cmpi ne, %2, %c0_i32_0 : i32
    scf.if %3 {
      %cst_21 = arith.constant 0.000000e+00 : f32
      %57 = vector.broadcast %cst_21 : f32 to vector<1x8x128xf32>
      %c0_22 = arith.constant 0 : index
      %c0_23 = arith.constant 0 : index
      %c0_24 = arith.constant 0 : index
      %58 = vector.load %arg8[%c0_22, %c0_23, %c0_24] : memref<1x8x128xf32, #tpu.memory_space<vmem>>, vector<1x8x128xf32>
      tpu.vector_store %arg8[%c0_22, %c0_23, %c0_24], %57 {strides = array<i32>} : memref<1x8x128xf32, #tpu.memory_space<vmem>>, vector<1x8x128xf32>,
    } else {
    }
    %c0_i32_1 = arith.constant 0 : i32
    %4 = arith.cmpi eq, %arg1, %c0_i32_1 : i32
    %c0_i32_2 = arith.constant 0 : i32
    %5 = arith.cmpi eq, %arg0, %c0_i32_2 : i32
    %6 = arith.andi %4, %5 : i1
    %7 = arith.extui %6 : i1 to i32
    %c0_i32_3 = arith.constant 0 : i32
    %8 = arith.cmpi ne, %7, %c0_i32_3 : i32
    scf.if %8 {
      %c0_21 = arith.constant 0 : index
      %c0_22 = arith.constant 0 : index
      %c0_23 = arith.constant 0 : index
      %57 = vector.load %arg4[%c0_21, %c0_22, %c0_23] : memref<2x8x31xf32, #tpu.memory_space<vmem>>, vector<2x8x31xf32>
      %c0_24 = arith.constant 0 : index
      %c0_25 = arith.constant 0 : index
      %c0_26 = arith.constant 0 : index
      %58 = vector.load %arg5[%c0_24, %c0_25, %c0_26] : memref<2x8x2xf32, #tpu.memory_space<vmem>>, vector<2x8x2xf32>
      %59 = vector.extract_strided_slice %58 {offsets = [0, 0, 0], sizes = [2, 8, 1], strides = [1, 1, 1]} : vector<2x8x2xf32> to vector<2x8x1xf32>
      %60 = arith.fptosi %59 : vector<2x8x1xf32> to vector<2x8x1xi32>
      %61 = vector.extract_strided_slice %58 {offsets = [0, 0, 1], sizes = [2, 8, 1], strides = [1, 1, 1]} : vector<2x8x2xf32> to vector<2x8x1xf32>
      %62 = tpu.iota {dimensions = array<i32: 2>} : vector<1x1x31xi32>
      %cst_27 = arith.constant dense<0xFF800000> : vector<2x8xf32>
      %63 = vector.multi_reduction <maximumf>, %57, %cst_27 [2] : vector<2x8x31xf32> to vector<2x8xf32>
      %64 = vector.shape_cast %63 : vector<2x8xf32> to vector<2x8x1xf32>
      %65 = vector.broadcast %64 : vector<2x8x1xf32> to vector<2x8x31xf32>
      %66 = arith.subf %57, %65 : vector<2x8x31xf32>
      %67 = math.exp %66 : vector<2x8x31xf32>
      %cst_28 = arith.constant dense<0.000000e+00> : vector<2x8xf32>
      %68 = vector.multi_reduction <add>, %67, %cst_28 [2] : vector<2x8x31xf32> to vector<2x8xf32>
      %69 = vector.shape_cast %68 : vector<2x8xf32> to vector<2x8x1xf32>
      %70 = math.log %69 : vector<2x8x1xf32>
      %71 = arith.addf %70, %64 : vector<2x8x1xf32>
      %72 = vector.broadcast %62 : vector<1x1x31xi32> to vector<2x8x31xi32>
      %73 = vector.broadcast %60 : vector<2x8x1xi32> to vector<2x8x31xi32>
      %74 = arith.cmpi eq, %72, %73 : vector<2x8x31xi32>
      %cst_29 = arith.constant 0.000000e+00 : f32
      %75 = vector.broadcast %cst_29 : f32 to vector<2x8x31xf32>
      %76 = arith.select %74, %57, %75 : vector<2x8x31xi1>, vector<2x8x31xf32>
      %cst_30 = arith.constant dense<0.000000e+00> : vector<2x8xf32>
      %77 = vector.multi_reduction <add>, %76, %cst_30 [2] : vector<2x8x31xf32> to vector<2x8xf32>
      %78 = vector.shape_cast %77 : vector<2x8xf32> to vector<2x8x1xf32>
      %79 = arith.subf %71, %78 : vector<2x8x1xf32>
      %80 = arith.mulf %79, %61 : vector<2x8x1xf32>
      %81 = vector.shape_cast %80 : vector<2x8x1xf32> to vector<1x2x8x1xf32>
      %cst_31 = arith.constant dense<0.000000e+00> : vector<1xf32>
      %82 = vector.multi_reduction <add>, %81, %cst_31 [1, 2, 3] : vector<1x2x8x1xf32> to vector<1xf32>
      %83 = vector.shape_cast %82 : vector<1xf32> to vector<1x1x1x1xf32>
      %84 = vector.extract %83[0, 0, 0, 0] : f32 from vector<1x1x1x1xf32>
      %85 = vector.shape_cast %61 : vector<2x8x1xf32> to vector<1x2x8x1xf32>
      %cst_32 = arith.constant dense<0.000000e+00> : vector<1xf32>
      %86 = vector.multi_reduction <add>, %85, %cst_32 [1, 2, 3] : vector<1x2x8x1xf32> to vector<1xf32>
      %87 = vector.shape_cast %86 : vector<1xf32> to vector<1x1x1x1xf32>
      %88 = vector.extract %87[0, 0, 0, 0] : f32 from vector<1x1x1x1xf32>
      %89 = vector.extract_strided_slice %57 {offsets = [0, 0, 30], sizes = [2, 8, 1], strides = [1, 1, 1]} : vector<2x8x31xf32> to vector<2x8x1xf32>
      %c30_i32 = arith.constant 30 : i32
      %90 = vector.broadcast %c30_i32 : i32 to vector<1x1x31xi32>
      %91 = arith.cmpi eq, %62, %90 : vector<1x1x31xi32>
      %cst_33 = arith.constant -1.000000e+30 : f32
      %92 = vector.shape_cast %91 : vector<1x1x31xi1> to vector<1x1x31xi1>
      %93 = vector.broadcast %92 : vector<1x1x31xi1> to vector<2x8x31xi1>
      %94 = vector.broadcast %cst_33 : f32 to vector<2x8x31xf32>
      %95 = arith.select %93, %94, %57 : vector<2x8x31xi1>, vector<2x8x31xf32>
      %cst_34 = arith.constant dense<0xFF800000> : vector<2x8xf32>
      %96 = vector.multi_reduction <maximumf>, %95, %cst_34 [2] : vector<2x8x31xf32> to vector<2x8xf32>
      %97 = vector.shape_cast %96 : vector<2x8xf32> to vector<2x8x1xf32>
      %98 = arith.cmpf oge, %97, %89 : vector<2x8x1xf32>
      %99 = arith.extui %98 : vector<2x8x1xi1> to vector<2x8x1xi32>
      %100 = arith.sitofp %99 : vector<2x8x1xi32> to vector<2x8x1xf32>
      %cst_35 = arith.constant dense<0.000000e+00> : vector<2x1xf32>
      %101 = vector.multi_reduction <add>, %100, %cst_35 [1] : vector<2x8x1xf32> to vector<2x1xf32>
      %c0_36 = arith.constant 0 : index
      %c0_37 = arith.constant 0 : index
      %102 = vector.load %arg6[%c0_36, %c0_37] : memref<2x1xf32, #tpu.memory_space<vmem>>, vector<2x1xf32>
      %103 = arith.subf %101, %102 : vector<2x1xf32>
      %104 = math.absf %103 : vector<2x1xf32>
      %105 = vector.shape_cast %104 : vector<2x1xf32> to vector<1x2x1xf32>
      %cst_38 = arith.constant dense<0.000000e+00> : vector<1xf32>
      %106 = vector.multi_reduction <add>, %105, %cst_38 [1, 2] : vector<1x2x1xf32> to vector<1xf32>
      %107 = vector.shape_cast %106 : vector<1xf32> to vector<1x1x1xf32>
      %108 = vector.extract %107[0, 0, 0] : f32 from vector<1x1x1xf32>
      %cst_39 = arith.constant 2.000000e+00 : f32
      %109 = arith.divf %108, %cst_39 : f32
      %c0_40 = arith.constant 0 : index
      %c0_41 = arith.constant 0 : index
      %110 = vector.load %arg7[%c0_40, %c0_41] : memref<8x128xf32, #tpu.memory_space<vmem>>, vector<8x128xf32>
      %111 = vector.extract_strided_slice %110 {offsets = [0, 0], sizes = [4, 128], strides = [1, 1]} : vector<8x128xf32> to vector<4x128xf32>
      %112 = vector.extract_strided_slice %110 {offsets = [4, 0], sizes = [4, 128], strides = [1, 1]} : vector<8x128xf32> to vector<4x128xf32>
      %113 = arith.subf %111, %112 : vector<4x128xf32>
      %114 = math.absf %113 : vector<4x128xf32>
      %115 = vector.shape_cast %114 : vector<4x128xf32> to vector<1x4x128xf32>
      %cst_42 = arith.constant dense<0.000000e+00> : vector<1xf32>
      %116 = vector.multi_reduction <add>, %115, %cst_42 [1, 2] : vector<1x4x128xf32> to vector<1xf32>
      %117 = vector.shape_cast %116 : vector<1xf32> to vector<1x1x1xf32>
      %118 = vector.extract %117[0, 0, 0] : f32 from vector<1x1x1xf32>
      %119 = vector.extract_strided_slice %111 {offsets = [0, 0], sizes = [2, 128], strides = [1, 1]} : vector<4x128xf32> to vector<2x128xf32>
      %120 = vector.extract_strided_slice %111 {offsets = [2, 0], sizes = [2, 128], strides = [1, 1]} : vector<4x128xf32> to vector<2x128xf32>
      %cst_43 = arith.constant 5.000000e-01 : f32
      %121 = vector.broadcast %cst_43 : f32 to vector<2x128xf32>
      %122 = arith.mulf %121, %120 : vector<2x128xf32>
      %123 = arith.subf %119, %122 : vector<2x128xf32>
      %124 = vector.extract_strided_slice %111 {offsets = [0, 0], sizes = [2, 128], strides = [1, 1]} : vector<4x128xf32> to vector<2x128xf32>
      %125 = vector.extract_strided_slice %111 {offsets = [2, 0], sizes = [2, 128], strides = [1, 1]} : vector<4x128xf32> to vector<2x128xf32>
      %cst_44 = arith.constant 5.000000e-01 : f32
      %126 = vector.broadcast %cst_44 : f32 to vector<2x128xf32>
      %127 = arith.mulf %126, %125 : vector<2x128xf32>
      %128 = arith.addf %124, %127 : vector<2x128xf32>
      %129 = vector.extract_strided_slice %112 {offsets = [0, 0], sizes = [2, 128], strides = [1, 1]} : vector<4x128xf32> to vector<2x128xf32>
      %130 = vector.extract_strided_slice %112 {offsets = [2, 0], sizes = [2, 128], strides = [1, 1]} : vector<4x128xf32> to vector<2x128xf32>
      %cst_45 = arith.constant 5.000000e-01 : f32
      %131 = vector.broadcast %cst_45 : f32 to vector<2x128xf32>
      %132 = arith.mulf %131, %130 : vector<2x128xf32>
      %133 = arith.subf %129, %132 : vector<2x128xf32>
      %134 = vector.extract_strided_slice %112 {offsets = [0, 0], sizes = [2, 128], strides = [1, 1]} : vector<4x128xf32> to vector<2x128xf32>
      %135 = vector.extract_strided_slice %112 {offsets = [2, 0], sizes = [2, 128], strides = [1, 1]} : vector<4x128xf32> to vector<2x128xf32>
      %cst_46 = arith.constant 5.000000e-01 : f32
      %136 = vector.broadcast %cst_46 : f32 to vector<2x128xf32>
      %137 = arith.mulf %136, %135 : vector<2x128xf32>
      %138 = arith.addf %134, %137 : vector<2x128xf32>
      %139 = arith.minimumf %128, %138 : vector<2x128xf32>
      %140 = arith.maximumf %123, %133 : vector<2x128xf32>
      %141 = arith.subf %139, %140 : vector<2x128xf32>
      %cst_47 = arith.constant 0.000000e+00 : f32
      %142 = vector.broadcast %cst_47 : f32 to vector<2x128xf32>
      %143 = arith.maximumf %141, %142 : vector<2x128xf32>
      %144 = arith.maximumf %128, %138 : vector<2x128xf32>
      %145 = arith.minimumf %123, %133 : vector<2x128xf32>
      %146 = arith.subf %144, %145 : vector<2x128xf32>
      %cst_48 = arith.constant 0.000000e+00 : f32
      %147 = vector.broadcast %cst_48 : f32 to vector<2x128xf32>
      %148 = arith.maximumf %146, %147 : vector<2x128xf32>
      %149 = arith.subf %128, %123 : vector<2x128xf32>
      %150 = arith.subf %138, %133 : vector<2x128xf32>
      %151 = vector.extract_strided_slice %143 {offsets = [0, 0], sizes = [1, 128], strides = [1, 1]} : vector<2x128xf32> to vector<1x128xf32>
      %152 = vector.extract_strided_slice %143 {offsets = [1, 0], sizes = [1, 128], strides = [1, 1]} : vector<2x128xf32> to vector<1x128xf32>
      %153 = arith.mulf %151, %152 : vector<1x128xf32>
      %154 = vector.extract_strided_slice %149 {offsets = [0, 0], sizes = [1, 128], strides = [1, 1]} : vector<2x128xf32> to vector<1x128xf32>
      %155 = vector.extract_strided_slice %149 {offsets = [1, 0], sizes = [1, 128], strides = [1, 1]} : vector<2x128xf32> to vector<1x128xf32>
      %156 = arith.mulf %154, %155 : vector<1x128xf32>
      %157 = vector.extract_strided_slice %150 {offsets = [0, 0], sizes = [1, 128], strides = [1, 1]} : vector<2x128xf32> to vector<1x128xf32>
      %158 = vector.extract_strided_slice %150 {offsets = [1, 0], sizes = [1, 128], strides = [1, 1]} : vector<2x128xf32> to vector<1x128xf32>
      %159 = arith.mulf %157, %158 : vector<1x128xf32>
      %160 = arith.addf %156, %159 : vector<1x128xf32>
      %161 = arith.subf %160, %153 : vector<1x128xf32>
      %162 = vector.extract_strided_slice %148 {offsets = [0, 0], sizes = [1, 128], strides = [1, 1]} : vector<2x128xf32> to vector<1x128xf32>
      %163 = vector.extract_strided_slice %148 {offsets = [1, 0], sizes = [1, 128], strides = [1, 1]} : vector<2x128xf32> to vector<1x128xf32>
      %164 = arith.mulf %162, %163 : vector<1x128xf32>
      %cst_49 = arith.constant 9.99999971E-10 : f32
      %165 = vector.broadcast %cst_49 : f32 to vector<1x128xf32>
      %166 = arith.maximumf %161, %165 : vector<1x128xf32>
      %167 = arith.divf %153, %166 : vector<1x128xf32>
      %168 = arith.subf %164, %161 : vector<1x128xf32>
      %cst_50 = arith.constant 9.99999971E-10 : f32
      %169 = vector.broadcast %cst_50 : f32 to vector<1x128xf32>
      %170 = arith.maximumf %164, %169 : vector<1x128xf32>
      %171 = arith.divf %168, %170 : vector<1x128xf32>
      %172 = arith.subf %167, %171 : vector<1x128xf32>
      %cst_51 = arith.constant 1.000000e+00 : f32
      %173 = vector.broadcast %cst_51 : f32 to vector<1x128xf32>
      %174 = arith.subf %173, %172 : vector<1x128xf32>
      %175 = vector.shape_cast %174 : vector<1x128xf32> to vector<1x1x128xf32>
      %cst_52 = arith.constant dense<0.000000e+00> : vector<1xf32>
      %176 = vector.multi_reduction <add>, %175, %cst_52 [1, 2] : vector<1x1x128xf32> to vector<1xf32>
      %177 = vector.shape_cast %176 : vector<1xf32> to vector<1x1x1xf32>
      %178 = vector.extract %177[0, 0, 0] : f32 from vector<1x1x1xf32>
      %c2_i32 = arith.constant 2 : i32
      %179 = vector.broadcast %c2_i32 : i32 to vector<1x1x128xi32>
      %180 = arith.cmpi eq, %0, %179 : vector<1x1x128xi32>
      %cst_53 = arith.constant 0.000000e+00 : f32
      %181 = vector.broadcast %84 : f32 to vector<1x1x128xf32>
      %182 = vector.broadcast %cst_53 : f32 to vector<1x1x128xf32>
      %183 = arith.select %180, %181, %182 : vector<1x1x128xi1>, vector<1x1x128xf32>
      %c3_i32 = arith.constant 3 : i32
      %184 = vector.broadcast %c3_i32 : i32 to vector<1x1x128xi32>
      %185 = arith.cmpi eq, %0, %184 : vector<1x1x128xi32>
      %cst_54 = arith.constant 0.000000e+00 : f32
      %186 = vector.broadcast %88 : f32 to vector<1x1x128xf32>
      %187 = vector.broadcast %cst_54 : f32 to vector<1x1x128xf32>
      %188 = arith.select %185, %186, %187 : vector<1x1x128xi1>, vector<1x1x128xf32>
      %189 = arith.addf %183, %188 : vector<1x1x128xf32>
      %c4_i32 = arith.constant 4 : i32
      %190 = vector.broadcast %c4_i32 : i32 to vector<1x1x128xi32>
      %191 = arith.cmpi eq, %0, %190 : vector<1x1x128xi32>
      %cst_55 = arith.constant 0.000000e+00 : f32
      %192 = vector.broadcast %109 : f32 to vector<1x1x128xf32>
      %193 = vector.broadcast %cst_55 : f32 to vector<1x1x128xf32>
      %194 = arith.select %191, %192, %193 : vector<1x1x128xi1>, vector<1x1x128xf32>
      %195 = arith.addf %189, %194 : vector<1x1x128xf32>
      %c5_i32 = arith.constant 5 : i32
      %196 = vector.broadcast %c5_i32 : i32 to vector<1x1x128xi32>
      %197 = arith.cmpi eq, %0, %196 : vector<1x1x128xi32>
      %cst_56 = arith.constant 0.000000e+00 : f32
      %198 = vector.broadcast %118 : f32 to vector<1x1x128xf32>
      %199 = vector.broadcast %cst_56 : f32 to vector<1x1x128xf32>
      %200 = arith.select %197, %198, %199 : vector<1x1x128xi1>, vector<1x1x128xf32>
      %201 = arith.addf %195, %200 : vector<1x1x128xf32>
      %c6_i32 = arith.constant 6 : i32
      %202 = vector.broadcast %c6_i32 : i32 to vector<1x1x128xi32>
      %203 = arith.cmpi eq, %0, %202 : vector<1x1x128xi32>
      %cst_57 = arith.constant 0.000000e+00 : f32
      %204 = vector.broadcast %178 : f32 to vector<1x1x128xf32>
      %205 = vector.broadcast %cst_57 : f32 to vector<1x1x128xf32>
      %206 = arith.select %203, %204, %205 : vector<1x1x128xi1>, vector<1x1x128xf32>
      %207 = arith.addf %201, %206 : vector<1x1x128xf32>
      %208 = vector.shape_cast %207 : vector<1x1x128xf32> to vector<1x1x128xf32>
      %209 = vector.broadcast %208 : vector<1x1x128xf32> to vector<1x8x128xf32>
      %c0_58 = arith.constant 0 : index
      %c0_59 = arith.constant 0 : index
      %c0_60 = arith.constant 0 : index
      %210 = vector.load %arg8[%c0_58, %c0_59, %c0_60] : memref<1x8x128xf32, #tpu.memory_space<vmem>>, vector<1x8x128xf32>
      tpu.vector_store %arg8[%c0_58, %c0_59, %c0_60], %209 {strides = array<i32>} : memref<1x8x128xf32, #tpu.memory_space<vmem>>, vector<1x8x128xf32>,
    } else {
    }
    %c0 = arith.constant 0 : index
    %c0_4 = arith.constant 0 : index
    %9 = vector.load %arg2[%c0, %c0_4] : memref<24x16xf32, #tpu.memory_space<vmem>>, vector<24x16xf32>
    %c0_5 = arith.constant 0 : index
    %c0_6 = arith.constant 0 : index
    %10 = vector.load %arg3[%c0_5, %c0_6] : memref<24x3xf32, #tpu.memory_space<vmem>>, vector<24x3xf32>
    %11 = vector.extract_strided_slice %10 {offsets = [0, 0], sizes = [24, 1], strides = [1, 1]} : vector<24x3xf32> to vector<24x1xf32>
    %12 = arith.fptosi %11 : vector<24x1xf32> to vector<24x1xi32>
    %13 = vector.extract_strided_slice %10 {offsets = [0, 1], sizes = [24, 1], strides = [1, 1]} : vector<24x3xf32> to vector<24x1xf32>
    %14 = vector.extract_strided_slice %10 {offsets = [0, 2], sizes = [24, 1], strides = [1, 1]} : vector<24x3xf32> to vector<24x1xf32>
    %15 = tpu.iota {dimensions = array<i32: 1>} : vector<1x16xi32>
    %cst = arith.constant dense<0xFF800000> : vector<24xf32>
    %16 = vector.multi_reduction <maximumf>, %9, %cst [1] : vector<24x16xf32> to vector<24xf32>
    %17 = vector.shape_cast %16 : vector<24xf32> to vector<24x1xf32>
    %18 = vector.broadcast %17 : vector<24x1xf32> to vector<24x16xf32>
    %19 = arith.subf %9, %18 : vector<24x16xf32>
    %20 = math.exp %19 : vector<24x16xf32>
    %cst_7 = arith.constant dense<0.000000e+00> : vector<24xf32>
    %21 = vector.multi_reduction <add>, %20, %cst_7 [1] : vector<24x16xf32> to vector<24xf32>
    %22 = vector.shape_cast %21 : vector<24xf32> to vector<24x1xf32>
    %23 = math.log %22 : vector<24x1xf32>
    %24 = arith.addf %23, %17 : vector<24x1xf32>
    %25 = vector.broadcast %15 : vector<1x16xi32> to vector<24x16xi32>
    %26 = vector.broadcast %12 : vector<24x1xi32> to vector<24x16xi32>
    %27 = arith.cmpi eq, %25, %26 : vector<24x16xi32>
    %cst_8 = arith.constant 0.000000e+00 : f32
    %28 = vector.broadcast %cst_8 : f32 to vector<24x16xf32>
    %29 = arith.select %27, %9, %28 : vector<24x16xi1>, vector<24x16xf32>
    %cst_9 = arith.constant dense<0.000000e+00> : vector<24xf32>
    %30 = vector.multi_reduction <add>, %29, %cst_9 [1] : vector<24x16xf32> to vector<24xf32>
    %31 = vector.shape_cast %30 : vector<24xf32> to vector<24x1xf32>
    %32 = arith.subf %24, %31 : vector<24x1xf32>
    %33 = arith.mulf %32, %13 : vector<24x1xf32>
    %34 = vector.shape_cast %33 : vector<24x1xf32> to vector<1x24x1xf32>
    %cst_10 = arith.constant dense<0.000000e+00> : vector<1xf32>
    %35 = vector.multi_reduction <add>, %34, %cst_10 [1, 2] : vector<1x24x1xf32> to vector<1xf32>
    %36 = vector.shape_cast %35 : vector<1xf32> to vector<1x1x1xf32>
    %37 = vector.extract %36[0, 0, 0] : f32 from vector<1x1x1xf32>
    %38 = vector.shape_cast %14 : vector<24x1xf32> to vector<1x24x1xf32>
    %cst_11 = arith.constant dense<0.000000e+00> : vector<1xf32>
    %39 = vector.multi_reduction <add>, %38, %cst_11 [1, 2] : vector<1x24x1xf32> to vector<1xf32>
    %40 = vector.shape_cast %39 : vector<1xf32> to vector<1x1x1xf32>
    %41 = vector.extract %40[0, 0, 0] : f32 from vector<1x1x1xf32>
    %c0_12 = arith.constant 0 : index
    %c0_13 = arith.constant 0 : index
    %c0_14 = arith.constant 0 : index
    %42 = vector.load %arg8[%c0_12, %c0_13, %c0_14] : memref<1x8x128xf32, #tpu.memory_space<vmem>>, vector<1x8x128xf32>
    %c0_i32_15 = arith.constant 0 : i32
    %43 = vector.broadcast %c0_i32_15 : i32 to vector<1x1x128xi32>
    %44 = arith.cmpi eq, %0, %43 : vector<1x1x128xi32>
    %cst_16 = arith.constant 0.000000e+00 : f32
    %45 = vector.broadcast %37 : f32 to vector<1x1x128xf32>
    %46 = vector.broadcast %cst_16 : f32 to vector<1x1x128xf32>
    %47 = arith.select %44, %45, %46 : vector<1x1x128xi1>, vector<1x1x128xf32>
    %c1_i32 = arith.constant 1 : i32
    %48 = vector.broadcast %c1_i32 : i32 to vector<1x1x128xi32>
    %49 = arith.cmpi eq, %0, %48 : vector<1x1x128xi32>
    %cst_17 = arith.constant 0.000000e+00 : f32
    %50 = vector.broadcast %41 : f32 to vector<1x1x128xf32>
    %51 = vector.broadcast %cst_17 : f32 to vector<1x1x128xf32>
    %52 = arith.select %49, %50, %51 : vector<1x1x128xi1>, vector<1x1x128xf32>
    %53 = arith.addf %47, %52 : vector<1x1x128xf32>
    %54 = vector.broadcast %53 : vector<1x1x128xf32> to vector<1x8x128xf32>
    %55 = arith.addf %42, %54 : vector<1x8x128xf32>
    %c0_18 = arith.constant 0 : index
    %c0_19 = arith.constant 0 : index
    %c0_20 = arith.constant 0 : index
    %56 = vector.load %arg8[%c0_18, %c0_19, %c0_20] : memref<1x8x128xf32, #tpu.memory_space<vmem>>, vector<1x8x128xf32>
    tpu.vector_store %arg8[%c0_18, %c0_19, %c0_20], %55 {strides = array<i32>} : memref<1x8x128xf32, #tpu.memory_space<vmem>>, vector<1x8x128xf32>,
    return
  }
  func.func @transform_0(%arg0: i32, %arg1: i32) -> (i32, i32) {
    %c1_i32 = arith.constant 1 : i32
    %0 = arith.muli %arg0, %c1_i32 : i32
    %1 = arith.addi %0, %arg1 : i32
    %c0_i32 = arith.constant 0 : i32
    %c0_i32_0 = arith.constant 0 : i32
    return %1, %c0_i32 : i32, i32
  }
  func.func @transform_1(%arg0: i32, %arg1: i32) -> (i32, i32) {
    %c1_i32 = arith.constant 1 : i32
    %0 = arith.muli %arg0, %c1_i32 : i32
    %1 = arith.addi %0, %arg1 : i32
    %c0_i32 = arith.constant 0 : i32
    %c0_i32_0 = arith.constant 0 : i32
    return %1, %c0_i32 : i32, i32
  }
  func.func @transform_2(%arg0: i32, %arg1: i32) -> (i32, i32, i32) {
    %c0_i32 = arith.constant 0 : i32
    %c0_i32_0 = arith.constant 0 : i32
    %c0_i32_1 = arith.constant 0 : i32
    %c0_i32_2 = arith.constant 0 : i32
    return %c0_i32, %c0_i32_0, %c0_i32_1 : i32, i32, i32
  }
  func.func @transform_3(%arg0: i32, %arg1: i32) -> (i32, i32, i32) {
    %c0_i32 = arith.constant 0 : i32
    %c0_i32_0 = arith.constant 0 : i32
    %c0_i32_1 = arith.constant 0 : i32
    %c0_i32_2 = arith.constant 0 : i32
    return %c0_i32, %c0_i32_0, %c0_i32_1 : i32, i32, i32
  }
  func.func @transform_4(%arg0: i32, %arg1: i32) -> (i32, i32) {
    %c0_i32 = arith.constant 0 : i32
    %c0_i32_0 = arith.constant 0 : i32
    %c0_i32_1 = arith.constant 0 : i32
    return %c0_i32, %c0_i32_0 : i32, i32
  }
  func.func @transform_5(%arg0: i32, %arg1: i32) -> (i32, i32) {
    %c0_i32 = arith.constant 0 : i32
    %c0_i32_0 = arith.constant 0 : i32
    %c0_i32_1 = arith.constant 0 : i32
    return %c0_i32, %c0_i32_0 : i32, i32
  }
  func.func @transform_6(%arg0: i32, %arg1: i32) -> (i32, i32, i32) {
    %c0_i32 = arith.constant 0 : i32
    %c0_i32_0 = arith.constant 0 : i32
    %c0_i32_1 = arith.constant 0 : i32
    return %arg0, %c0_i32, %c0_i32_0 : i32, i32, i32
  }
}

</mosaic_0001>

<bundles_post_ra>
// kernel: _fused_losses_call.1
= control target key start
LH: loop header
LB: loop body
LE: loop exit
PB: predicated region body
PF: predicated region fallthrough
CT: control target
= control target key end

     0   :  { %s945_s21 = smov 0   ;;  %s947_s22 = smov 0   ;;  %s1097_s0 = inlined_call_operand.vmem [shape: f32[48,16], index: 0, kind: input, shape index: {}]   ;;  %s1098_s1 = inlined_call_operand.vmem [shape: f32[48,3], index: 1, kind: input, shape index: {}]   ;;  %s1099_s2 = inlined_call_operand.vmem [shape: f32[2,8,31], index: 2, kind: input, shape index: {}]   ;;  %s1100_s3 = inlined_call_operand.vmem [shape: f32[2,8,2], index: 3, kind: input, shape index: {}]   ;;  %s1101_s4 = inlined_call_operand.vmem [shape: f32[2,1], index: 4, kind: input, shape index: {}]   ;;  %s1102_s5 = inlined_call_operand.vmem [shape: f32[8,128], index: 5, kind: input, shape index: {}]   ;;  %s1103_s6 = inlined_call_operand.vmem [shape: f32[2,8,128], index: 6, kind: output, shape index: {}]  }
   0x1   :  { %s949_s23 = smov 0  }
   0x2 LB: > { %s28_s24 = sadd.s32 1, %s895_s22  ;;  %p782_p0 = scmp.ge.s32.totalorder %s899_s23, 1  ;;  %s899_s23 = sphi %s949_s23, %s16_s23   ;;  %s895_s22 = sphi %s947_s22, %s1105_s22   ;;  %s891_s21 = sphi %s945_s21, %s1104_s21  }
   0x3   : > { %p30_p1 = scmp.ge.s32.totalorder %s28_s24, 2  ;;  %p244_p2 = scmp.lt.s32.totalorder %s899_s23, 3 }
   0x5   : > { %s1107_s24 = smov (%p30_p1, %s28_s24), 0  ;;  %p245_p3 = pnand %p782_p0, %p244_p2 }
   0x6   : > { %s281_s25 = smul.u32 (!%p245_p3), 3, %s891_s21  ;;  %p296_p4 = scmp.lt.s32.totalorder (!%p245_p3), %s891_s21, 1 }
   0x7   : > { %248 = sbr.rel (%p245_p3) target bundleno = 1320 (0x528), region = 44  ;;  %p307_p5 = scmp.eq.s32.totalorder (!%p245_p3), %s891_s21, 0 }
   0x8   : > { %p282_p6 = scmp.lt.s32.totalorder (!%p245_p3), %s281_s25, 5 }
   0xc   : > { %v300_v0 = vlaneseq  ;;  %s1109_s21 = smov (!%p296_p4, %s891_s21), 1  ;;  %s1111_s25 = smov (!%p282_p6, %s281_s25), 5  ;;  %v901_v2 = vmov 0.0   ;;  %v984_v3 = vld [vmem:[%s1099_s2] sm:$0xff] (%p307_p5)  ;;  %vm318_vm0 = vcmask (%p307_p5), 252928   ;;  %v989_v4 = vld [vmem:[%s1099_s2 + $0x8] sm:$0xff] (%p307_p5) }
   0xd   : > { %s785_s26 = sshll.u32 %s1109_s21, 3  ;;  %s783_s27 = sshll.u32 %s1111_s25, 3  ;;  %v994_v5 = vld [vmem:[%s1100_s3] sm:$0xff] (%p307_p5)  ;;  %v319_v6 = vsel (%p307_p5), %vm318_vm0, %v984_v3, -inf  ;;  %v902_v7 = vmov (%p307_p5), 0   ;;  %v1002_v9 = vld [vmem:[%s1100_s3 + $0x8] sm:$0xff] (%p307_p5) }
   0xe   : > { %v963_v1 = vand.u32 127, %v300_v0  ;;  %s968_s30 = scalar_lea.vmem %s1103_s6, %s785_s26  ;;  %s973_s9 = scalar_lea.vmem %s1097_s0, %s783_s27  ;;  %849 = vset.pattern.permute.xlu1 (%p307_p5), %v902_v7  ;;  %v792_v8 = vtrunc.f32 (%p307_p5), %v994_v5  ;;  %850 = vset.pattern.permute.xlu0 (%p307_p5), %v902_v7  ;;  %v794_v10 = vtrunc.f32 (%p307_p5), %v1002_v9  ;;  %v322_v11 = vsel (%p307_p5), %vm318_vm0, %v989_v4, -inf  ;;  %v436_v34 = vld [vmem:[%s1101_s4] sm:$0x3] (%p307_p5) }
   0xf   : > { %s978_s12 = scalar_lea.vmem %s1098_s1, %s783_s27  ;;  %306 = vst [vmem:[%s968_s30] sm:$0xff] %v901_v2  ;;  %311 = sbr.rel (!%p307_p5) target bundleno = 667 (0x29b), region = 52  ;;  %320 = vmax.xlane.f32.xlu0 (%p307_p5), %v319_v6  ;;  %v438_v35 = vrot.slane (%p307_p5), %v436_v34, 1  ;;  %vm421_vm6 = vcmask (%p307_p5), 253168   ;;  %v905_v39 = vmov (%p307_p5), 0.0   ;;  %vm452_vm7 = vcmask (%p307_p5), 1041409  }
  0x10   : > { %vm404_vm1 = vcmp.eq.s32.totalorder (%p307_p5), %v963_v1, 30  ;;  %v793_v12 = vcvt.f32.s32 (%p307_p5), %v792_v8  ;;  %v795_v14 = vcvt.f32.s32 (%p307_p5), %v794_v10  ;;  %s903_s26 = smov (%p307_p5), 30   ;;  %s904_s27 = smov (%p307_p5), 127   ;;  %vm371_vm8 = vcmask (%p307_p5), 7168  }
  0x11   : > { %v408_v13 = vsel (%p307_p5), %vm404_vm1, -1e+30, %v989_v4  ;;  %v407_v16 = vsel (%p307_p5), %vm404_vm1, -1e+30, %v984_v3  ;;  %s906_s28 = smov (%p307_p5), 98   ;;  %vm457_vm9 = vcmask (%p307_p5), 1024  }
  0x12   : > { %344 = vperm.xlu1 (%p307_p5), %849, %v793_v12   ;;  %v412_v15 = vsel (%p307_p5), %vm318_vm0, %v408_v13, -inf  ;;  %v409_v17 = vsel (%p307_p5), %vm318_vm0, %v407_v16, -inf  ;;  %vm535_vm10 = vcmask (%p307_p5), 1040384   ;;  %vm477_vm11 = vcmask (%p307_p5), 1043456  }
  0x13   : > { %323 = vmax.xlane.f32.xlu0 (%p307_p5), %v322_v11  ;;  %vm546_vm12 = vcmp.eq.s32.totalorder (%p307_p5), %v963_v1, 2  ;;  %vm549_vm13 = vcmp.eq.s32.totalorder (%p307_p5), %v963_v1, 3  ;;  %vm553_vm14 = vcmp.eq.s32.totalorder (%p307_p5), %v963_v1, 4  ;;  %vm557_vm15 = vcmp.eq.s32.totalorder (%p307_p5), %v963_v1, 5 }
  0x16   : > { %347 = vperm.xlu1 %849, %v795_v14  }
  0x17   : > { %413 = vmax.xlane.f32.xlu0 %v412_v15 }
  0x1b   : > { %410 = vmax.xlane.f32.xlu0 %v409_v17 }
  0x8d   : > { %v345_v18 = vpop.permute.xlu1 %344 }
  0x8e   : > { %vm349_vm2 = vcmp.eq.s32.totalorder %v963_v1, %v345_v18 }
  0x8f   : > { %v351_v19 = vsel %vm349_vm2, %v984_v3, 0.0 }
  0x90   : > { %v353_v20 = vsel %vm318_vm0, %v351_v19, 0.0 }
  0x91   : > { %v348_v21 = vpop.permute.xlu1 %347  ;;  %354 = vadd.xlane.f32.xlu0 %v353_v20 }
  0x92   : > { %vm350_vm3 = vcmp.eq.s32.totalorder %v963_v1, %v348_v21 }
  0x93   : > { %v352_v22 = vsel %vm350_vm3, %v989_v4, 0.0 }
  0x94   : > { %v356_v23 = vsel %vm318_vm0, %v352_v22, 0.0 }
  0x95   : > { %357 = vadd.xlane.f32.xlu0 %v356_v23 }
  0x98   : > { %v321_v24 = vpop.xlane.xlu0 %320 }
  0x99   : > { %v325_v25 = vsub.f32 %v984_v3, %v321_v24 }
  0x9b   : > { %v327_v26 = vmul.f32 1.442695, %v325_v25 }
  0x9c   : > { %v324_v27 = vpop.xlane.xlu0 %323 }
  0x9d   : > { %851 = vpow2.f32 %v327_v26  ;;  %v326_v28 = vsub.f32 %v989_v4, %v324_v27 }
  0x9f   : > { %v329_v29 = vmul.f32 1.442695, %v326_v28 }
  0xa0   : > { %v414_v36 = vpop.xlane.xlu0 %413 }
  0xa1   : > { %853 = vpow2.f32 %v329_v29  ;;  %vm416_vm4 = vcmp.ge.f32.partialorder %v414_v36, %v989_v4 }
  0xa2   : > { %v788_v40 = vsel %vm416_vm4, 1.0, %v905_v39 }
  0xa3   : > { %v429_v42 = vsel %vm421_vm6, %v788_v40, 0.0 }
  0xa4   : > { %v411_v37 = vpop.xlane.xlu0 %410  ;;  %v430_v45 = vrot.slane %v429_v42, 4 }
  0xa5   : > { %vm415_vm5 = vcmp.ge.f32.partialorder %v411_v37, %v984_v3 }
  0xa6   : > { %v787_v41 = vsel %vm415_vm5, 1.0, %v905_v39  ;;  %v431_v48 = vadd.f32 %v430_v45, %v429_v42 }
  0xa7   : > { %v422_v44 = vsel %vm421_vm6, %v787_v41, 0.0 }
  0xa8   : > { %v423_v46 = vrot.slane %v422_v44, 4  ;;  %v432_v51 = vrot.slane %v431_v48, 2 }
  0xaa   : > { %v852_v30 = vpop.eup %851  ;;  %v424_v49 = vadd.f32 %v423_v46, %v422_v44  ;;  %v433_v53 = vadd.f32 %v432_v51, %v431_v48 }
  0xab   : > { %v331_v31 = vsel %vm318_vm0, %v852_v30, 0.0 }
  0xac   : > { %332 = vadd.xlane.f32.xlu0 %v331_v31  ;;  %v425_v52 = vrot.slane %v424_v49, 2  ;;  %v434_v56 = vrot.slane %v433_v53, 1 }
  0xae   : > { %v854_v32 = vpop.eup %853  ;;  %v426_v54 = vadd.f32 %v425_v52, %v424_v49  ;;  %v435_v62 = vadd.f32 %v434_v56, %v433_v53 }
  0xaf   : > { %v334_v33 = vsel %vm318_vm0, %v854_v32, 0.0  ;;  %vm561_vm0 = vcmp.eq.s32.totalorder %v963_v1, 6 }
  0xb0   : > { %335 = vadd.xlane.f32.xlu1 %v334_v33  ;;  %v427_v58 = vrot.slane %v426_v54, 1 }
  0xb2   : > { %v428_v4 = vadd.f32 %v427_v58, %v426_v54 }
  0xc1   : > { %439 = vrot.lane.b32.xlu1 %v436_v34, %s903_s26 }
  0xc2   : > { %441 = vrot.lane.b32.xlu0 %v438_v35, %s903_s26 }
  0xc5   : > { %388 = vrot.lane.b32.xlu1 %v1002_v9, %s904_s27 }
  0xc6   : > { %386 = vrot.lane.b32.xlu0 %v994_v5, %s904_s27 }
 0x11a   : > { %v355_v38 = vpop.xlane.xlu0 %354 }
 0x11e   : > { %v358_v43 = vpop.xlane.xlu0 %357 }
 0x135   : > { %v333_v47 = vpop.xlane.xlu0 %332 }
 0x136   : > { %855 = vlog2.f32 %v333_v47 }
 0x139   : > { %v336_v50 = vpop.xlane.xlu1 %335  ;;  %v442_v60 = vpop.permute.xlu0 %441 }
 0x13a   : > { %857 = vlog2.f32 %v336_v50  ;;  %v446_v3 = vsub.f32 %v435_v62, %v442_v60 }
 0x13c   : > { %v448_v11 = vand.u32 2147483647, %v446_v3 }
 0x13d   : > { %v440_v0 = vpop.permute.xlu1 %439  ;;  %v387_v17 = vpop.permute.xlu0 %386 }
 0x13e   : > { %v445_v8 = vsub.f32 %v428_v4, %v440_v0  ;;  %v451_v14 = vrot.slane %v448_v11, 7  ;;  %v392_v18 = vsel %vm371_vm8, %v387_v17, 0.0 }
 0x140   : > { %v447_v13 = vand.u32 2147483647, %v445_v8 }
 0x141   : > { %v389_v16 = vpop.permute.xlu1 %388 }
 0x142   : > { %v453_v15 = vsel %vm452_vm7, %v451_v14, %v447_v13 }
 0x143   : > { %v856_v55 = vpop.eup %855 }
 0x144   : > { %v338_v57 = vmul.f32 0.6931472, %v856_v55 }
 0x146   : > { %v341_v59 = vadd.f32 %v338_v57, %v321_v24 }
 0x147   : > { %v858_v61 = vpop.eup %857 }
 0x148   : > { %v340_v63 = vmul.f32 0.6931472, %v858_v61  ;;  %v359_v2 = vsub.f32 %v341_v59, %v355_v38 }
 0x14a   : > { %v342_v6 = vadd.f32 %v340_v63, %v324_v27  ;;  %v361_v7 = vmul.f32 %v359_v2, %v994_v5  ;;  %v393_v5 = vsel %vm371_vm8, %v389_v16, 0.0 }
 0x14b   : > { %v394_v19 = vadd.f32 %v393_v5, %v392_v18 }
 0x14c   : > { %365 = vrot.lane.b32.xlu0 %v361_v7, %s904_s27  ;;  %v360_v10 = vsub.f32 %v342_v6, %v358_v43 }
 0x14e   : > { %v362_v12 = vmul.f32 %v360_v10, %v1002_v9  ;;  %v471_v9 = vld [vmem:[%s1102_s5] sm:$0xff] }
 0x14f   : > { %v488_v20 = vmul.f32 0.5, %v471_v9  ;;  %v473_v51 = vrot.slane %v471_v9, 4 }
 0x150   : > { %367 = vrot.lane.b32.xlu0 %v362_v12, %s904_s27 }
 0x151   : > { %v490_v21 = vrot.slane %v488_v20, 2  ;;  %v475_v54 = vsub.f32 %v471_v9, %v473_v51 }
 0x153   : > { %v492_v22 = vsub.f32 %v471_v9, %v490_v21  ;;  %v493_v23 = vadd.f32 %v490_v21, %v471_v9  ;;  %v476_v60 = vand.u32 2147483647, %v475_v54 }
 0x154   : > { %454 = vrot.lane.b32.xlu0 %v453_v15, %s906_s28 }
 0x155   : > { %v495_v24 = vrot.slane %v493_v23, 4  ;;  %v499_v25 = vrot.slane %v492_v22, 4  ;;  %v508_v28 = vsub.f32 %v493_v23, %v492_v22  ;;  %v478_v0 = vsel %vm477_vm11, %v476_v60, 0.0 }
 0x157   : > { %v497_v26 = vmin.f32 %v493_v23, %v495_v24  ;;  %v501_v27 = vmax.f32 %v492_v22, %v499_v25  ;;  %v514_v30 = vrot.slane %v508_v28, 1  ;;  %v504_v31 = vmax.f32 %v493_v23, %v495_v24 }
 0x158   : > { %v505_v32 = vmin.f32 %v492_v22, %v499_v25 }
 0x159   : > { %v502_v29 = vsub.f32 %v497_v26, %v501_v27  ;;  %v516_v34 = vmul.f32 %v514_v30, %v508_v28 }
 0x15a   : > { %v506_v35 = vsub.f32 %v504_v31, %v505_v32 }
 0x15b   : > { %v503_v33 = vmax.f32 %v502_v29, 0.0  ;;  %v518_v37 = vrot.slane %v516_v34, 4 }
 0x15c   : > { %v507_v38 = vmax.f32 %v506_v35, 0.0 }
 0x15d   : > { %v510_v36 = vrot.slane %v503_v33, 1  ;;  %v520_v40 = vadd.f32 %v518_v37, %v516_v34 }
 0x15e   : > { %v523_v41 = vrot.slane %v507_v38, 1 }
 0x15f   : > { %v512_v39 = vmul.f32 %v510_v36, %v503_v33 }
 0x160   : > { %v525_v43 = vmul.f32 %v523_v41, %v507_v38 }
 0x161   : > { %v521_v42 = vsub.f32 %v520_v40, %v512_v39 }
 0x162   : > { %v530_v45 = vmax.f32 %v525_v43, 1e-09 }
 0x163   : > { %v526_v44 = vmax.f32 %v521_v42, 1e-09  ;;  %v529_v47 = vsub.f32 %v525_v43, %v521_v42 }
 0x165   : > { %859 = vrcp.f32 %v526_v44 }
 0x166   : > { %861 = vrcp.f32 %v530_v45 }
 0x172   : > { %v860_v46 = vpop.eup %859 }
 0x173   : > { %395 = vadd.xlane.f32.xlu0 %v394_v19  ;;  %v862_v48 = vpop.eup %861  ;;  %v528_v49 = vmul.f32 %v860_v46, %v512_v39 }
 0x174   : > { %v532_v50 = vmul.f32 %v862_v48, %v529_v47 }
 0x176   : > { %v533_v53 = vsub.f32 %v528_v49, %v532_v50 }
 0x178   : > { %v534_v58 = vsub.f32 1.0, %v533_v53 }
 0x17a   : > { %v536_v63 = vsel %vm535_vm10, %v534_v58, 0.0 }
 0x1be   : > { %v366_v52 = vpop.permute.xlu0 %365 }
 0x1bf   : > { %v372_v56 = vsel %vm371_vm8, %v366_v52, 0.0 }
 0x1c2   : > { %v368_v55 = vpop.permute.xlu0 %367 }
 0x1c3   : > { %v373_v57 = vsel %vm371_vm8, %v368_v55, 0.0 }
 0x1c4   : > { %v374_v59 = vadd.f32 %v373_v57, %v372_v56 }
 0x1c6   : > { %375 = vadd.xlane.f32.xlu1 %v374_v59  ;;  %v455_v61 = vpop.permute.xlu0 %454 }
 0x1c7   : > { %v458_v62 = vsel %vm457_vm9, %v455_v61, 0.0 }
 0x1c8   : > { %459 = vadd.xlane.f32.xlu0 %v458_v62 }
 0x1ca   : > { %537 = vadd.xlane.f32.xlu1 %v536_v63 }
 0x1cc   : > { %479 = vadd.xlane.f32.xlu0 %v478_v0 }
 0x1fc   : > { %v396_v2 = vpop.xlane.xlu0 %395 }
 0x1fd   : > { %v397_v3 = vrot.slane %v396_v2, 4 }
 0x1ff   : > { %v398_v4 = vadd.f32 %v397_v3, %v396_v2 }
 0x201   : > { %v399_v6 = vrot.slane %v398_v4, 2 }
 0x203   : > { %v400_v14 = vadd.f32 %v399_v6, %v398_v4 }
 0x205   : > { %v401_v21 = vrot.slane %v400_v14, 1 }
 0x207   : > { %v402_v30 = vadd.f32 %v401_v21, %v400_v14 }
 0x24f   : > { %v376_v7 = vpop.xlane.xlu1 %375 }
 0x250   : > { %v377_v8 = vrot.slane %v376_v7, 4 }
 0x251   : > { %v460_v10 = vpop.xlane.xlu0 %459 }
 0x252   : > { %v378_v11 = vadd.f32 %v377_v8, %v376_v7  ;;  %v461_v12 = vrot.slane %v460_v10, 4 }
 0x253   : > { %v538_v13 = vpop.xlane.xlu1 %537 }
 0x254   : > { %v379_v15 = vrot.slane %v378_v11, 2  ;;  %v462_v16 = vadd.f32 %v461_v12, %v460_v10  ;;  %v539_v17 = vrot.slane %v538_v13, 4 }
 0x255   : > { %v480_v5 = vpop.xlane.xlu0 %479 }
 0x256   : > { %v463_v18 = vrot.slane %v462_v16, 2  ;;  %v540_v19 = vadd.f32 %v539_v17, %v538_v13  ;;  %v481_v9 = vrot.slane %v480_v5, 4  ;;  %v380_v20 = vadd.f32 %v379_v15, %v378_v11 }
 0x258   : > { %v541_v22 = vrot.slane %v540_v19, 2  ;;  %v482_v23 = vadd.f32 %v481_v9, %v480_v5  ;;  %v381_v24 = vrot.slane %v380_v20, 1  ;;  %v464_v25 = vadd.f32 %v463_v18, %v462_v16 }
 0x25a   : > { %v542_v26 = vadd.f32 %v541_v22, %v540_v19  ;;  %v483_v27 = vrot.slane %v482_v23, 2  ;;  %v382_v28 = vadd.f32 %v381_v24, %v380_v20  ;;  %v465_v29 = vrot.slane %v464_v25, 1 }
 0x25c   : > { %v484_v31 = vadd.f32 %v483_v27, %v482_v23  ;;  %796 = vpush %v382_v28  ;;  %v466_v32 = vadd.f32 %v465_v29, %v464_v25  ;;  %v543_v33 = vrot.slane %v542_v26, 1 }
 0x25d   : > { %798 = vpush %v402_v30 }
 0x25e   : > { %800 = vpush %v466_v32  ;;  %v485_v34 = vrot.slane %v484_v31, 1  ;;  %v544_v36 = vadd.f32 %v543_v33, %v542_v26 }
 0x260   : > { %v486_v35 = vadd.f32 %v485_v34, %v484_v31 }
 0x262   : > { %802 = vpush %v486_v35 }
 0x263   : > { %804 = vpush %v544_v36 }
 0x28d   : > { %s797_s8 = spop %796 }
 0x28e   : > { %v547_v37 = vstv %s797_s8  ;;  %s799_s10 = spop %798 }
 0x28f   : > { %v548_v38 = vsel %vm546_vm12, %v547_v37, 0.0  ;;  %v550_v39 = vstv %s799_s10  ;;  %s801_s11 = spop %800 }
 0x290   : > { %v551_v40 = vsel %vm549_vm13, %v550_v39, 0.0  ;;  %s470_s13 = smul.f32 0.5, %s801_s11 }
 0x291   : > { %v552_v41 = vadd.f32 %v551_v40, %v548_v38 }
 0x292   : > { %v554_v42 = vstv %s470_s13 }
 0x293   : > { %v555_v43 = vsel %vm553_vm14, %v554_v42, 0.0  ;;  %s803_s14 = spop %802 }
 0x294   : > { %v556_v44 = vadd.f32 %v555_v43, %v552_v41  ;;  %v558_v45 = vstv %s803_s14  ;;  %s805_s15 = spop %804 }
 0x295   : > { %v559_v46 = vsel %vm557_vm15, %v558_v45, 0.0  ;;  %v562_v47 = vstv %s805_s15 }
 0x296   : > { %v560_v48 = vadd.f32 %v559_v46, %v556_v44  ;;  %v563_v49 = vsel %vm561_vm0, %v562_v47, 0.0 }
 0x298   : > { %v564_v50 = vadd.f32 %v563_v49, %v560_v48 }
 0x29a   : > { %565 = vst [vmem:[%s968_s30] sm:$0xff] %v564_v50 }
 0x29b PF: > { %v566_v51 = vld [vmem:[%s973_s9] sm:$0xff]  ;;  %vm575_vm1 = vcmask 130048   ;;  %v568_v52 = vld [vmem:[%s973_s9 + $0x10] sm:$0xff]  ;;  %v567_v53 = vld [vmem:[%s973_s9 + $0x8] sm:$0xff]  ;;  %v907_v56 = vmov 0   ;;  %s908_s9 = smov 126  }
 0x29c   : > { %v576_v54 = vsel %vm575_vm1, %v566_v51, -inf  ;;  %v582_v55 = vsel %vm575_vm1, %v568_v52, -inf  ;;  %863 = vset.pattern.permute.xlu1 %v907_v56  ;;  %864 = vset.pattern.permute.xlu0 %v907_v56  ;;  %v579_v57 = vsel %vm575_vm1, %v567_v53, -inf  ;;  %v1055_v58 = vld [vmem:[%s978_s12] sm:$0xff]  ;;  %v1059_v60 = vld [vmem:[%s978_s12 + $0x10] sm:$0xff]  ;;  %v1063_v63 = vld [vmem:[%s978_s12 + $0x8] sm:$0xff] }
 0x29d   : > { %577 = vmax.xlane.f32.xlu0 %v576_v54  ;;  %583 = vmax.xlane.f32.xlu1 %v582_v55  ;;  %v806_v59 = vtrunc.f32 %v1055_v58  ;;  %v810_v62 = vtrunc.f32 %v1059_v60  ;;  %v808_v2 = vtrunc.f32 %v1063_v63  ;;  %s909_s12 = smov 127   ;;  %vm654_vm5 = vcmask 7168  }
 0x29e   : > { %vm696_vm6 = vcmp.eq.s32.totalorder %v963_v1, 0  ;;  %vm699_vm7 = vcmp.eq.s32.totalorder %v963_v1, 1 }
 0x29f   : > { %v807_v61 = vcvt.f32.s32 %v806_v59  ;;  %v811_v0 = vcvt.f32.s32 %v810_v62  ;;  %v809_v3 = vcvt.f32.s32 %v808_v2 }
 0x2a1   : > { %580 = vmax.xlane.f32.xlu0 %v579_v57 }
 0x2ae   : > { %613 = vperm.xlu1 %863, %v807_v61  }
 0x2b2   : > { %619 = vperm.xlu1 %863, %v811_v0  }
 0x2b7   : > { %616 = vperm.xlu0 %864, %v809_v3  }
 0x326   : > { %v578_v4 = vpop.xlane.xlu0 %577  ;;  %v584_v6 = vpop.xlane.xlu1 %583 }
 0x327   : > { %v585_v7 = vsub.f32 %v566_v51, %v578_v4  ;;  %v587_v8 = vsub.f32 %v568_v52, %v584_v6 }
 0x329   : > { %v588_v10 = vmul.f32 1.442695, %v585_v7  ;;  %v592_v11 = vmul.f32 1.442695, %v587_v8 }
 0x32a   : > { %v581_v12 = vpop.xlane.xlu0 %580  ;;  %v614_v15 = vpop.permute.xlu1 %613 }
 0x32b   : > { %865 = vpow2.f32 %v588_v10  ;;  %v586_v13 = vsub.f32 %v567_v53, %v581_v12  ;;  %vm621_vm2 = vcmp.eq.s32.totalorder %v963_v1, %v614_v15 }
 0x32c   : > { %867 = vpow2.f32 %v592_v11  ;;  %v624_v20 = vsel %vm621_vm2, %v566_v51, 0.0 }
 0x32d   : > { %v590_v14 = vmul.f32 1.442695, %v586_v13  ;;  %v627_v23 = vsel %vm575_vm1, %v624_v20, 0.0 }
 0x32e   : > { %v620_v22 = vpop.permute.xlu1 %619 }
 0x32f   : > { %869 = vpow2.f32 %v590_v14  ;;  %vm623_vm4 = vcmp.eq.s32.totalorder %v963_v1, %v620_v22 }
 0x330   : > { %v626_v26 = vsel %vm623_vm4, %v568_v52, 0.0 }
 0x331   : > { %v633_v27 = vsel %vm575_vm1, %v626_v26, 0.0 }
 0x332   : > { %v617_v18 = vpop.permute.xlu0 %616 }
 0x333   : > { %vm622_vm3 = vcmp.eq.s32.totalorder %v963_v1, %v617_v18 }
 0x334   : > { %v625_v24 = vsel %vm622_vm3, %v567_v53, 0.0 }
 0x335   : > { %v630_v25 = vsel %vm575_vm1, %v625_v24, 0.0 }
 0x338   : > { %v866_v16 = vpop.eup %865 }
 0x339   : > { %v868_v17 = vpop.eup %867  ;;  %v594_v5 = vsel %vm575_vm1, %v866_v16, 0.0 }
 0x33a   : > { %595 = vadd.xlane.f32.xlu1 %v594_v5  ;;  %v600_v19 = vsel %vm575_vm1, %v868_v17, 0.0 }
 0x33c   : > { %v870_v9 = vpop.eup %869 }
 0x33d   : > { %v597_v21 = vsel %vm575_vm1, %v870_v9, 0.0  ;;  %v695_v9 = vld [vmem:[%s968_s30] sm:$0xff] }
 0x33e   : > { %601 = vadd.xlane.f32.xlu1 %v600_v19  ;;  %598 = vadd.xlane.f32.xlu0 %v597_v21 }
 0x342   : > { %628 = vadd.xlane.f32.xlu1 %v627_v23 }
 0x346   : > { %631 = vadd.xlane.f32.xlu1 %v630_v25 }
 0x34a   : > { %634 = vadd.xlane.f32.xlu1 %v633_v27 }
 0x35b   : > { %672 = vrot.lane.b32.xlu1 %v1055_v58, %s908_s9 }
 0x35f   : > { %674 = vrot.lane.b32.xlu1 %v1063_v63, %s908_s9 }
 0x3c3   : > { %v596_v28 = vpop.xlane.xlu1 %595 }
 0x3c4   : > { %871 = vlog2.f32 %v596_v28 }
 0x3c7   : > { %v602_v29 = vpop.xlane.xlu1 %601  ;;  %v599_v30 = vpop.xlane.xlu0 %598 }
 0x3c8   : > { %873 = vlog2.f32 %v602_v29 }
 0x3c9   : > { %875 = vlog2.f32 %v599_v30 }
 0x3cb   : > { %v629_v31 = vpop.xlane.xlu1 %628 }
 0x3cf   : > { %v632_v34 = vpop.xlane.xlu1 %631 }
 0x3d1   : > { %v872_v32 = vpop.eup %871 }
 0x3d2   : > { %v604_v33 = vmul.f32 0.6931472, %v872_v32 }
 0x3d3   : > { %v635_v44 = vpop.xlane.xlu1 %634 }
 0x3d4   : > { %v609_v35 = vadd.f32 %v604_v33, %v578_v4 }
 0x3d5   : > { %v874_v36 = vpop.eup %873 }
 0x3d6   : > { %v876_v37 = vpop.eup %875  ;;  %v608_v38 = vmul.f32 0.6931472, %v874_v36  ;;  %v636_v39 = vsub.f32 %v609_v35, %v629_v31 }
 0x3d7   : > { %v606_v40 = vmul.f32 0.6931472, %v876_v37  ;;  %v673_v49 = vpop.permute.xlu1 %672 }
 0x3d8   : > { %v639_v41 = vmul.f32 %v636_v39, %v1055_v58  ;;  %v611_v42 = vadd.f32 %v608_v38, %v584_v6  ;;  %v681_v54 = vsel %vm654_vm5, %v673_v49, 0.0 }
 0x3d9   : > { %v610_v43 = vadd.f32 %v606_v40, %v581_v12 }
 0x3da   : > { %v638_v45 = vsub.f32 %v611_v42, %v635_v44  ;;  %645 = vrot.lane.b32.xlu1 %v639_v41, %s909_s12 }
 0x3db   : > { %v637_v46 = vsub.f32 %v610_v43, %v632_v34  ;;  %v675_v50 = vpop.permute.xlu1 %674 }
 0x3dc   : > { %v641_v47 = vmul.f32 %v638_v45, %v1059_v60  ;;  %v682_v55 = vsel %vm654_vm5, %v675_v50, 0.0 }
 0x3dd   : > { %v640_v48 = vmul.f32 %v637_v46, %v1063_v63  ;;  %v683_v61 = vadd.f32 %v682_v55, %v681_v54 }
 0x3de   : > { %649 = vrot.lane.b32.xlu1 %v641_v47, %s909_s12 }
 0x3df   : > { %647 = vrot.lane.b32.xlu0 %v640_v48, %s909_s12 }
 0x3e3   : > { %676 = vrot.lane.b32.xlu0 %v1059_v60, %s908_s9 }
 0x44c   : > { %v646_v51 = vpop.permute.xlu1 %645 }
 0x44d   : > { %v655_v56 = vsel %vm654_vm5, %v646_v51, 0.0 }
 0x450   : > { %v650_v52 = vpop.permute.xlu1 %649 }
 0x451   : > { %v648_v53 = vpop.permute.xlu0 %647  ;;  %v658_v59 = vsel %vm654_vm5, %v650_v52, 0.0 }
 0x452   : > { %v656_v57 = vsel %vm654_vm5, %v648_v53, 0.0 }
 0x453   : > { %v657_v58 = vadd.f32 %v656_v57, %v655_v56 }
 0x455   : > { %v677_v62 = vpop.permute.xlu0 %676  ;;  %v659_v63 = vadd.f32 %v658_v59, %v657_v58 }
 0x456   : > { %v684_v0 = vsel %vm654_vm5, %v677_v62, 0.0 }
 0x457   : > { %660 = vadd.xlane.f32.xlu1 %v659_v63  ;;  %v685_v2 = vadd.f32 %v684_v0, %v683_v61 }
 0x459   : > { %686 = vadd.xlane.f32.xlu0 %v685_v2 }
 0x4e0   : > { %v661_v60 = vpop.xlane.xlu1 %660 }
 0x4e1   : > { %v662_v3 = vrot.slane %v661_v60, 4 }
 0x4e2   : > { %v687_v4 = vpop.xlane.xlu0 %686 }
 0x4e3   : > { %v663_v6 = vadd.f32 %v662_v3, %v661_v60  ;;  %v688_v7 = vrot.slane %v687_v4, 4 }
 0x4e5   : > { %v664_v8 = vrot.slane %v663_v6, 2  ;;  %v689_v10 = vadd.f32 %v688_v7, %v687_v4 }
 0x4e7   : > { %v690_v11 = vrot.slane %v689_v10, 2  ;;  %v665_v12 = vadd.f32 %v664_v8, %v663_v6 }
 0x4e9   : > { %v691_v13 = vadd.f32 %v690_v11, %v689_v10  ;;  %v666_v14 = vrot.slane %v665_v12, 1 }
 0x4eb   : > { %v667_v15 = vadd.f32 %v666_v14, %v665_v12  ;;  %v692_v16 = vrot.slane %v691_v13, 1 }
 0x4ed   : > { %812 = vpush %v667_v15  ;;  %v693_v17 = vadd.f32 %v692_v16, %v691_v13 }
 0x4ef   : > { %814 = vpush %v693_v17 }
 0x51e   : > { %s813_s16 = spop %812 }
 0x51f   : > { %v697_v5 = vstv %s813_s16 }
 0x520   : > { %s815_s17 = spop %814  ;;  %v698_v19 = vsel %vm696_vm6, %v697_v5, 0.0 }
 0x521   : > { %v700_v18 = vstv %s815_s17 }
 0x522   : > { %v701_v20 = vsel %vm699_vm7, %v700_v18, 0.0 }
 0x523   : > { %v702_v21 = vadd.f32 %v701_v20, %v698_v19 }
 0x525   : > { %v703_v22 = vadd.f32 %v702_v21, %v695_v9 }
 0x527   : > { %704 = vst [vmem:[%s968_s30] sm:$0xff] %v703_v22 }
 0x528 PF: > { %s16_s23 = sadd.s32 1, %s899_s23   ;;  %s1104_s21 = smov %s895_s22 }
 0x529   : > { %p13_p7 = scmp.ge.s32.totalorder %s16_s23, 4   ;;  %s1105_s22 = smov %s1107_s24 }
 0x52b   :  { %15 = sbr.rel (!%p13_p7) target bundleno = 2 (0x2), region = 85 }

</bundles_post_ra>
